<compile_context>
chip_gen: v5e
topology: v5e:2x2
jax: 0.10.0
libtpu: 0.0.40
codegen_flags: <defaults>
</compile_context>

<pallas_src>
import math

import jax
import jax.numpy as jnp
from jax import lax
from jax.experimental import pallas as pl
from jax.experimental.pallas import tpu as pltpu

_INV_SQRT2 = 1.0 / math.sqrt(2.0)

# Tile-size targets (f32): ~2 MiB per x block. Measured elementwise-add data
# shows >=85% of HBM roofline at 1-4 MiB blocks; 2 MiB keeps the
# double-buffered x + out well under every chip's default scoped VMEM limit.
_MAX_TILE_COLS = 2048
_TARGET_BLOCK_ELEMS = (2 * 1024 * 1024) // 4  # 2 MiB of f32


def _kgl_kernel(x_ref, a_ref, b_ref, o_ref):
    # x_ref: (tile_rows, tile_cols)
    # a_ref / b_ref: (tile_rows, 1) or (1, tile_cols) — broadcast against x.
    #   a = 1/sigma, b = -mu/sigma  =>  norm = x*a + b = (x - mu)/sigma
    x = x_ref[...].astype(jnp.float32)
    norm = x * a_ref[...] + b_ref[...]
    # w = where(p < 0.5, p, 1-p) with p = 0.5*(1+erf(norm/sqrt2))
    #   == 0.5*(1 - erf(|norm|/sqrt2))   (exactly equal, incl. p == 0.5)
    w = 0.5 * (1.0 - lax.erf(jnp.abs(norm) * _INV_SQRT2))
    o_ref[...] = (w * x).astype(o_ref.dtype)


def _pick_tiles(n, m):
    """Pick (tile_rows, tile_cols) satisfying the (8, 128) block constraint."""
    # Columns (lane axis): full dim if small enough, else a multiple of 128.
    if m <= _MAX_TILE_COLS:
        tile_cols = m                       # equals full dim -> always legal
    else:
        tile_cols = _MAX_TILE_COLS          # multiple of 128

    # Rows (sublane axis): multiple of 8, sized so the block is ~2 MiB.
    rows_target = max(8, (_TARGET_BLOCK_ELEMS // tile_cols) // 8 * 8)
    if n <= rows_target:
        tile_rows = n                       # equals full dim -> legal
    else:
        tile_rows = rows_target             # multiple of 8
    return tile_rows, tile_cols


def _kgl_2d(x2d, a, b):
    """Elementwise Gaussian weighting on a 2-D array.

    x2d: (N, M)
    a, b: (N, 1) or (1, M) float32 params broadcasting against x2d
          (a = 1/sigma, b = -mu/sigma).
    """
    n, m = x2d.shape
    tile_rows, tile_cols = _pick_tiles(n, m)
    grid = (pl.cdiv(n, tile_rows), pl.cdiv(m, tile_cols))

    x_spec = pl.BlockSpec((tile_rows, tile_cols), lambda i, j: (i, j))

    if a.shape == (n, 1):
        # Column params: broadcast along lanes, constant block index along the
        # inner (column) grid axis -> stays VMEM-resident, no re-DMA per step.
        p_spec = pl.BlockSpec((tile_rows, 1), lambda i, j: (i, 0))
    elif a.shape == (1, m):
        # Row params: broadcast along sublanes.
        p_spec = pl.BlockSpec((1, tile_cols), lambda i, j: (0, j))
    else:
        raise ValueError(f"param shape {a.shape} does not broadcast to {x2d.shape}")

    return pl.pallas_call(
        _kgl_kernel,
        out_shape=jax.ShapeDtypeStruct((n, m), x2d.dtype),
        grid_spec=pltpu.PrefetchScalarGridSpec(
            num_scalar_prefetch=0,
            grid=grid,
            in_specs=[x_spec, p_spec, p_spec],
            out_specs=x_spec,
        ),
        compiler_params=pltpu.CompilerParams(
            dimension_semantics=("parallel", "parallel"),
        ),
    )(x2d, a.astype(jnp.float32), b.astype(jnp.float32))


class KernelGaussianLayerPallas:
    def __init__(self, in_channels=64, mu_threshold=0.0, sigma_threshold=0.1,
                 key=None):
        if key is None:
            key = jax.random.PRNGKey(0)
        k_mu, k_sigma = jax.random.split(key)
        # torch.empty(1, C).normal_(std=2)  /  abs(...)
        self.mu = 2.0 * jax.random.normal(k_mu, (1, in_channels), jnp.float32)
        self.sigma = jnp.abs(
            2.0 * jax.random.normal(k_sigma, (1, in_channels), jnp.float32))
        self.mu_threshold = float(mu_threshold)
        self.sigma_threshold = float(sigma_threshold)
        self.in_channels = in_channels

    def __call__(self, x):
        # Parameter clamp + per-channel precompute: tiny (1, C) plain-JAX glue,
        # negligible next to the mem-bound elementwise pass.
        mu = jnp.maximum(self.mu, self.mu_threshold)            # (1, C)
        sigma = jnp.maximum(self.sigma, self.sigma_threshold)   # (1, C)
        inv_sigma = 1.0 / sigma                                  # (1, C)
        shift = -mu * inv_sigma                                  # (1, C)

        if x.ndim == 2:
            # (B, C): already channel-last; params broadcast along lanes.
            return _kgl_2d(x, inv_sigma, shift)
        elif x.ndim == 4:
            # NCHW -> (B*C, H*W): free contiguous reshape, no transposes.
            b, c, h, w = x.shape
            x2d = x.reshape(b * c, h * w)
            a = jnp.broadcast_to(inv_sigma, (b, c)).reshape(b * c, 1)
            s = jnp.broadcast_to(shift, (b, c)).reshape(b * c, 1)
            out = _kgl_2d(x2d, a, s)
            return out.reshape(b, c, h, w)
        else:
            raise ValueError(f"Unsupported ndim {x.ndim}")


def _reference(x, mu, sigma, mu_threshold, sigma_threshold):
    mu = jnp.maximum(mu, mu_threshold)
    sigma = jnp.maximum(sigma, sigma_threshold)
    if x.ndim == 4:
        mu = mu.reshape(1, -1, 1, 1)
        sigma = sigma.reshape(1, -1, 1, 1)
    norm = (x - mu) / sigma
    p = 0.5 * (1.0 + lax.erf(norm / jnp.sqrt(2.0)))
    w = jnp.where(p < 0.5, p, 1.0 - p)
    return w * x


if __name__ == "__main__":
    key = jax.random.PRNGKey(0)
    k_params, k_x4, k_x2, k_x4b, k_x4c = jax.random.split(key, 5)

    C = 4
    layer = KernelGaussianLayerPallas(in_channels=C, key=k_params)

    # 4-D (NCHW) input, like a conv feature map.
    x4 = jax.random.normal(k_x4, (2, C, 16, 16), jnp.float32)
    out4 = jax.block_until_ready(layer(x4))
    ref4 = _reference(x4, layer.mu, layer.sigma,
                      layer.mu_threshold, layer.sigma_threshold)
    assert out4.shape == x4.shape
    assert jnp.allclose(out4, ref4, atol=1e-5, rtol=1e-5)

    # 2-D (B, C) input path.
    x2 = jax.random.normal(k_x2, (8, C), jnp.float32)
    out2 = jax.block_until_ready(layer(x2))
    ref2 = _reference(x2, layer.mu, layer.sigma,
                      layer.mu_threshold, layer.sigma_threshold)
    assert out2.shape == x2.shape
    assert jnp.allclose(out2, ref2, atol=1e-5, rtol=1e-5)

    # 4-D with non-(8,128)-aligned spatial dims (full-dim blocks path).
    layer3 = KernelGaussianLayerPallas(in_channels=3, key=k_params)
    x4b = jax.random.normal(k_x4b, (2, 3, 20, 20), jnp.float32)
    out4b = jax.block_until_ready(layer3(x4b))
    ref4b = _reference(x4b, layer3.mu, layer3.sigma,
                       layer3.mu_threshold, layer3.sigma_threshold)
    assert jnp.allclose(out4b, ref4b, atol=1e-5, rtol=1e-5)

    # 4-D large-spatial case exercising a multi-block grid with a partial
    # last column block (H*W = 2400 > tile_cols = 2048).
    layer5 = KernelGaussianLayerPallas(in_channels=5, key=k_params)
    x4c = jax.random.normal(k_x4c, (1, 5, 48, 50), jnp.float32)
    out4c = jax.block_until_ready(layer5(x4c))
    ref4c = _reference(x4c, layer5.mu, layer5.sigma,
                       layer5.mu_threshold, layer5.sigma_threshold)
    assert jnp.allclose(out4c, ref4c, atol=1e-5, rtol=1e-5)

    print("KERNEL_OK")
</pallas_src>

<mosaic_0001>
module attributes {stable_mosaic.version = 11 : i64} {
  func.func @_kgl_kernel(%arg0: i32, %arg1: i32, %arg2: memref<8x256xf32, #tpu.memory_space<vmem>>, %arg3: memref<8x1xf32, #tpu.memory_space<vmem>>, %arg4: memref<8x1xf32, #tpu.memory_space<vmem>>, %arg5: memref<8x256xf32, #tpu.memory_space<vmem>>) attributes {dimension_semantics = [#tpu.dimension_semantics<parallel>, #tpu.dimension_semantics<parallel>], iteration_bounds = array<i64: 1, 1>, scalar_prefetch = 0 : i64, scratch_operands = 0 : i64, tpu.core_type = #tpu.core_type<tc>, window_params = [{transform_indices = @transform_0, window_bounds = array<i64: 8, 256>}, {transform_indices = @transform_1, window_bounds = array<i64: 8, 1>}, {transform_indices = @transform_2, window_bounds = array<i64: 8, 1>}, {transform_indices = @transform_3, window_bounds = array<i64: 8, 256>}]} {
    %c0 = arith.constant 0 : index
    %c0_0 = arith.constant 0 : index
    %0 = vector.load %arg2[%c0, %c0_0] : memref<8x256xf32, #tpu.memory_space<vmem>>, vector<8x256xf32>
    %c0_1 = arith.constant 0 : index
    %c0_2 = arith.constant 0 : index
    %1 = vector.load %arg3[%c0_1, %c0_2] : memref<8x1xf32, #tpu.memory_space<vmem>>, vector<8x1xf32>
    %2 = vector.broadcast %1 : vector<8x1xf32> to vector<8x256xf32>
    %3 = arith.mulf %0, %2 : vector<8x256xf32>
    %c0_3 = arith.constant 0 : index
    %c0_4 = arith.constant 0 : index
    %4 = vector.load %arg4[%c0_3, %c0_4] : memref<8x1xf32, #tpu.memory_space<vmem>>, vector<8x1xf32>
    %5 = vector.broadcast %4 : vector<8x1xf32> to vector<8x256xf32>
    %6 = arith.addf %3, %5 : vector<8x256xf32>
    %7 = math.absf %6 : vector<8x256xf32>
    %cst = arith.constant 0.707106769 : f32
    %8 = vector.broadcast %cst : f32 to vector<8x256xf32>
    %9 = arith.mulf %7, %8 : vector<8x256xf32>
    %10 = math.erf %9 : vector<8x256xf32>
    %cst_5 = arith.constant 1.000000e+00 : f32
    %11 = vector.broadcast %cst_5 : f32 to vector<8x256xf32>
    %12 = arith.subf %11, %10 : vector<8x256xf32>
    %cst_6 = arith.constant 5.000000e-01 : f32
    %13 = vector.broadcast %cst_6 : f32 to vector<8x256xf32>
    %14 = arith.mulf %13, %12 : vector<8x256xf32>
    %15 = arith.mulf %14, %0 : vector<8x256xf32>
    %c0_7 = arith.constant 0 : index
    %c0_8 = arith.constant 0 : index
    %16 = vector.load %arg5[%c0_7, %c0_8] : memref<8x256xf32, #tpu.memory_space<vmem>>, vector<8x256xf32>
    tpu.vector_store %arg5[%c0_7, %c0_8], %15 {strides = array<i32>} : memref<8x256xf32, #tpu.memory_space<vmem>>, vector<8x256xf32>,
    return
  }
  func.func @transform_0(%arg0: i32, %arg1: i32) -> (i32, i32) {
    %c0_i32 = arith.constant 0 : i32
    return %arg0, %arg1 : i32, i32
  }
  func.func @transform_1(%arg0: i32, %arg1: i32) -> (i32, i32) {
    %c0_i32 = arith.constant 0 : i32
    %c0_i32_0 = arith.constant 0 : i32
    return %arg0, %c0_i32 : i32, i32
  }
  func.func @transform_2(%arg0: i32, %arg1: i32) -> (i32, i32) {
    %c0_i32 = arith.constant 0 : i32
    %c0_i32_0 = arith.constant 0 : i32
    return %arg0, %c0_i32 : i32, i32
  }
  func.func @transform_3(%arg0: i32, %arg1: i32) -> (i32, i32) {
    %c0_i32 = arith.constant 0 : i32
    return %arg0, %arg1 : i32, i32
  }
}

</mosaic_0001>

<bundles_post_ra>
// kernel: tpu_custom_call.1
= control target key start
LH: loop header
LB: loop body
LE: loop exit
PB: predicated region body
PF: predicated region fallthrough
CT: control target
= control target key end

     0   :  { %s231_s0 = inlined_call_operand.vmem [shape: f32[8,256], index: 0, kind: input, shape index: {}]   ;;  %s232_s1 = inlined_call_operand.vmem [shape: f32[8,1], index: 1, kind: input, shape index: {}]   ;;  %s233_s2 = inlined_call_operand.vmem [shape: f32[8,1], index: 2, kind: input, shape index: {}]   ;;  %s234_s3 = inlined_call_operand.hbm [shape: f32[8,256], index: 3, kind: output, shape index: {}]  }
   0x1   :  { %v17_v0 = vld [vmem:[%s232_s1] sm:$0xff] }
   0x2   :  { %8 = vsyncpa [#allocation3], 0  ;;  %v176_v1 = vmov 0   ;;  %v25_v2 = vld [vmem:[%s233_s2] sm:$0xff]  ;;  %v212_v5 = vld [vmem:[%s231_s0 + $0x8] sm:$0xff]  ;;  %s132_s21 = sshll.u32 %s234_s3, 4  ;;  %s133_s21 = int_to_ptr.hbm [resolvable:$true] %s132_s21 }
   0x3   :  { %145 = vset.pattern.permute.xlu0 %v176_v1  ;;  %v207_v4 = vld [vmem:[%s231_s0] sm:$0xff]  ;;  %s177_s0 = smov [#allocation2]  }
   0x4   :  { %20 = vperm.xlu0 %145, %v17_v0   ;;  %s130_s1 = sshll.u32 %s177_s0, 4  ;;  %s131_s1 = int_to_ptr.vmem [resolvable:$true] %s130_s1 }
   0xc   :  { %28 = vperm.xlu0 %145, %v25_v2  }
  0x76   :  { %v21_v3 = vpop.permute.xlu0 %20 }
  0x77   :  { %v23_v6 = vmul.f32 %v21_v3, %v207_v4  ;;  %v24_v7 = vmul.f32 %v21_v3, %v212_v5 }
  0x7e   :  { %v29_v8 = vpop.permute.xlu0 %28 }
  0x7f   :  { %v31_v9 = vadd.f32 %v29_v8, %v23_v6  ;;  %v32_v10 = vadd.f32 %v29_v8, %v24_v7 }
  0x81   :  { %v33_v11 = vand.u32 2147483647, %v31_v9  ;;  %v34_v12 = vand.u32 2147483647, %v32_v10 }
  0x83   :  { %v216_v13 = vmul.f32 0.70710677, %v33_v11  ;;  %v218_v14 = vmul.f32 0.70710677, %v34_v12 }
  0x85   :  { %v37_v15 = vmul.f32 %v216_v13, %v216_v13  ;;  %v77_v16 = vmul.f32 %v218_v14, %v218_v14 }
  0x87   :  { %v38_v17 = vmin.f32 %v37_v15, 16.0  ;;  %v78_v18 = vmin.f32 %v77_v16, 16.0 }
  0x89   :  { %v39_v19 = vmul.f32 2.1237322e-06, %v38_v17  ;;  %v50_v20 = vmul.f32 3.8918573e-05, %v38_v17  ;;  %v79_v21 = vmul.f32 2.1237322e-06, %v78_v18 }
  0x8a   :  { %v90_v22 = vmul.f32 3.8918573e-05, %v78_v18 }
  0x8b   :  { %v40_v23 = vadd.f32 0.00028619796, %v39_v19  ;;  %v51_v24 = vadd.f32 0.001143296, %v50_v20  ;;  %v80_v25 = vadd.f32 0.00028619796, %v79_v21 }
  0x8c   :  { %v91_v26 = vadd.f32 0.001143296, %v90_v22 }
  0x8d   :  { %v41_v27 = vmul.f32 %v40_v23, %v38_v17  ;;  %v52_v28 = vmul.f32 %v51_v24, %v38_v17  ;;  %v81_v29 = vmul.f32 %v80_v25, %v78_v18 }
  0x8e   :  { %v92_v30 = vmul.f32 %v91_v26, %v78_v18 }
  0x8f   :  { %v42_v31 = vadd.f32 0.0036580483, %v41_v27  ;;  %v53_v32 = vadd.f32 0.014752088, %v52_v28  ;;  %v82_v35 = vadd.f32 0.0036580483, %v81_v29 }
  0x90   :  { %v93_v33 = vadd.f32 0.014752088, %v92_v30 }
  0x91   :  { %v54_v34 = vmul.f32 %v53_v32, %v38_v17  ;;  %v43_v37 = vmul.f32 %v42_v31, %v38_v17  ;;  %v83_v41 = vmul.f32 %v82_v35, %v78_v18 }
  0x92   :  { %v94_v36 = vmul.f32 %v93_v33, %v78_v18 }
  0x93   :  { %v55_v38 = vadd.f32 0.112945676, %v54_v34  ;;  %v44_v43 = vadd.f32 0.05243302, %v43_v37  ;;  %v84_v47 = vadd.f32 0.05243302, %v83_v41 }
  0x94   :  { %v95_v39 = vadd.f32 0.112945676, %v94_v36 }
  0x95   :  { %v56_v40 = vmul.f32 %v55_v38, %v38_v17  ;;  %v45_v49 = vmul.f32 %v44_v43, %v38_v17  ;;  %v85_v52 = vmul.f32 %v84_v47, %v78_v18 }
  0x96   :  { %v96_v42 = vmul.f32 %v95_v39, %v78_v18 }
  0x97   :  { %v57_v44 = vadd.f32 0.4994258, %v56_v40  ;;  %v46_v53 = vadd.f32 0.18741608, %v45_v49  ;;  %v86_v54 = vadd.f32 0.18741608, %v85_v52 }
  0x98   :  { %v97_v45 = vadd.f32 0.4994258, %v96_v42 }
  0x99   :  { %v58_v46 = vmul.f32 %v57_v44, %v38_v17  ;;  %v47_v56 = vmul.f32 %v46_v53, %v38_v17  ;;  %v87_v59 = vmul.f32 %v86_v54, %v78_v18 }
  0x9a   :  { %v98_v48 = vmul.f32 %v97_v45, %v78_v18 }
  0x9b   :  { %v59_v50 = vadd.f32 1.0, %v58_v46  ;;  %v48_v62 = vadd.f32 1.1283791, %v47_v56  ;;  %v88_v6 = vadd.f32 1.1283791, %v87_v59 }
  0x9c   :  { %v99_v51 = vadd.f32 1.0, %v98_v48 }
  0x9d   :  { %146 = vrcp.f32 %v59_v50  ;;  %v71_v63 = vand.u32 2147483648, %v59_v50  ;;  %v69_v2 = vand.u32 2147483647, %v59_v50  ;;  %vm65_vm2 = vweird.f32 %v59_v50 }
  0x9e   :  { %148 = vrcp.f32 %v99_v51  ;;  %v111_v3 = vand.u32 2147483648, %v99_v51  ;;  %v109_v8 = vand.u32 2147483647, %v99_v51  ;;  %vm105_vm4 = vweird.f32 %v99_v51 }
  0x9f   :  { %v72_v10 = vor.u32 1.1754944e-38, %v71_v63  ;;  %v49_v12 = vmul.f32 %v48_v62, %v216_v13  ;;  %vm70_vm5 = vcmp.eq.f32.partialorder %v69_v2, 8.507059e+37  ;;  %v89_v18 = vmul.f32 %v88_v6, %v218_v14 }
  0xa0   :  { %v112_v16 = vor.u32 1.1754944e-38, %v111_v3  ;;  %vm110_vm7 = vcmp.eq.f32.partialorder %v109_v8, 8.507059e+37 }
  0xa3   :  { %v147_v55 = vpop.eup %146 }
  0xa4   :  { %v149_v57 = vpop.eup %148  ;;  %v61_v58 = vmul.f32 %v147_v55, %v59_v50  ;;  %vm66_vm0 = vweird.f32 %v147_v55 }
  0xa5   :  { %v101_v60 = vmul.f32 %v149_v57, %v99_v51  ;;  %vm106_vm1 = vweird.f32 %v149_v57  ;;  %vm67_vm3 = vmor %vm65_vm2, %vm66_vm0 }
  0xa6   :  { %v62_v61 = vsub.f32 1.0, %v61_v58  ;;  %vm107_vm6 = vmor %vm105_vm4, %vm106_vm1 }
  0xa7   :  { %v102_v0 = vsub.f32 1.0, %v101_v60 }
  0xa8   :  { %v63_v1 = vmul.f32 %v147_v55, %v62_v61 }
  0xa9   :  { %v103_v7 = vmul.f32 %v149_v57, %v102_v0 }
  0xaa   :  { %v64_v9 = vadd.f32 %v147_v55, %v63_v1 }
  0xab   :  { %v104_v11 = vadd.f32 %v149_v57, %v103_v7 }
  0xac   :  { %v68_v15 = vsel %vm67_vm3, %v147_v55, %v64_v9 }
  0xad   :  { %v73_v17 = vsel %vm70_vm5, %v72_v10, %v68_v15  ;;  %v108_v19 = vsel %vm107_vm6, %v149_v57, %v104_v11 }
  0xae   :  { %v74_v20 = vmul.f32 %v73_v17, %v49_v12  ;;  %v113_v21 = vsel %vm110_vm7, %v112_v16, %v108_v19 }
  0xaf   :  { %v114_v22 = vmul.f32 %v113_v21, %v89_v18 }
  0xb0   :  { %v141_v23 = vclamps-f32 %v74_v20, 1.0 }
  0xb1   :  { %v142_v24 = vclamps-f32 %v114_v22, 1.0 }
  0xb2   :  { %v117_v25 = vsub.f32 1.0, %v141_v23 }
  0xb3   :  { %v118_v26 = vsub.f32 1.0, %v142_v24 }
  0xb4   :  { %v119_v27 = vmul.f32 0.5, %v117_v25 }
  0xb5   :  { %v120_v13 = vmul.f32 0.5, %v118_v26 }
  0xb6   :  { %v121_v28 = vmul.f32 %v119_v27, %v207_v4 }
  0xb7   :  { %v122_v14 = vmul.f32 %v120_v13, %v212_v5 }
  0xb8   :  { %123 = vst [vmem:[#allocation2] sm:$0xff] %v121_v28 }
  0xb9   :  { %124 = vst [vmem:[#allocation2 + $0x8] sm:$0xff] %v122_v14 }
  0xba   :  { %135 = dma.vmem_to_hbm [thread:$0]  %s131_s1, 256, %s133_s21, [#allocation3]  }
  0xbb   :  { %174 = dma.done.wait [#allocation3], 256  }
  0xbc   :  { %175 = vsyncadd [#allocation3], 4294967040 }
  0xbd   :  { %140 = vsyncpa [#allocation3], 1 }

</bundles_post_ra>
